<compile_context>
chip_gen: v7x
topology: tpu7x:2x2x1
jax: 0.10.0
libtpu: 0.0.40
codegen_flags: <defaults>
</compile_context>

<pallas_src>
import jax
import jax.numpy as jnp
from jax.experimental import pallas as pl
from jax.experimental.pallas import tpu as pltpu

_LANES = 128


def _cdiv(a: int, b: int) -> int:
    return -(-a // b)


def _round_up(a: int, b: int) -> int:
    return _cdiv(a, b) * b


def _mish_kernel(x_ref, o_ref):
    xf = x_ref[...].astype(jnp.float32)
    # One transcendental per element; rest is cheap VPU work.
    u = jnp.exp(-jnp.abs(xf))
    t = u + u                       # 2u
    u2 = u * u
    pos = xf >= 0.0
    num = jnp.where(pos, 1.0, u2) + t
    den = num + jnp.where(pos, u2 + u2, 2.0)
    if o_ref.dtype == jnp.float32:
        r = num / den               # exact divide: keeps 1e-5 f32 tolerance
    else:
        r = num * pl.reciprocal(den, approx=True)   # EUP slot; fine for bf16/f16
    o_ref[...] = (xf * r).astype(o_ref.dtype)


def _mish_pallas_2d(x2d: jax.Array, *, target_block_bytes: int = 2 << 20,
                    donate: bool = False) -> jax.Array:
    """Run the Mish kernel on a lane-dense (rows, 128) slab."""
    rows, lanes = x2d.shape
    assert lanes == _LANES
    dtype = x2d.dtype
    itemsize = jnp.dtype(dtype).itemsize
    sub = {4: 8, 2: 16, 1: 32}.get(itemsize, 8)      # sublane packing

    total_bytes = rows * lanes * itemsize
    if total_bytes < 2 * target_block_bytes or rows <= sub:
        # Small input: a single block equal to the full array (always legal,
        # no forced grid split -> no per-step overhead on v5e/v6e).
        tr = rows
    else:
        # Large input: ~2 MiB blocks; shape the grid to an even count >= 4 so
        # v7x's two TensorCores stay balanced (harmless on v5e/v6e since per
        # step data is still >= ~1 MiB).
        tr = max(sub, (target_block_bytes // (lanes * itemsize)) // sub * sub)
        g = max(4, _cdiv(rows, tr))
        if g % 2:
            g += 1
        tr = max(sub, _round_up(_cdiv(rows, g), sub))
    grid = (_cdiv(rows, tr),)

    n_eff = rows * lanes
    cost = pl.CostEstimate(
        flops=12 * n_eff,
        transcendentals=n_eff,
        bytes_accessed=2 * n_eff * itemsize,
    )

    return pl.pallas_call(
        _mish_kernel,
        out_shape=jax.ShapeDtypeStruct((rows, lanes), dtype),
        grid_spec=pltpu.PrefetchScalarGridSpec(
            num_scalar_prefetch=0,
            grid=grid,
            in_specs=[pl.BlockSpec((tr, lanes), lambda i: (i, 0))],
            out_specs=pl.BlockSpec((tr, lanes), lambda i: (i, 0)),
        ),
        compiler_params=pltpu.CompilerParams(
            dimension_semantics=("parallel",),
            vmem_limit_bytes=32 << 20,
        ),
        cost_estimate=cost,
        input_output_aliases=({0: 0} if donate else {}),
    )(x2d)


def _mish_xla(x):
    xf = x.astype(jnp.float32)
    return (xf * jnp.tanh(jax.nn.softplus(xf))).astype(x.dtype)


def mish(x: jax.Array, *, donate: bool = False) -> jax.Array:
    """Mish activation, matching `x * torch.tanh(F.softplus(x))`."""
    orig_shape = x.shape
    n = x.size
    if n == 0:
        return x

    if n % _LANES == 0:
        # Fast path: metadata-only reshape to a lane-dense slab, no pad, no
        # slice-back.  Rows not divisible by the sublane packing / tile rows
        # are handled by the partial boundary block.
        rows = n // _LANES
        y2d = _mish_pallas_2d(x.reshape(rows, _LANES), donate=donate)
        return y2d.reshape(orig_shape)

    # Ragged: stream the %128 body through the kernel, finish the <128-element
    # tail with plain XLA (no full-array pad / slice round trips).
    # TODO(synk): zero-copy ragged tail via manual DMA (P4) if ragged shapes become hot.
    flat = x.reshape(-1)
    n_body = (n // _LANES) * _LANES
    if n_body == 0:
        return _mish_xla(flat).reshape(orig_shape)
    body = _mish_pallas_2d(flat[:n_body].reshape(-1, _LANES))
    tail = _mish_xla(flat[n_body:])
    return jnp.concatenate([body.reshape(-1), tail]).reshape(orig_shape)


def mish_ref(x):
    xf = x.astype(jnp.float32)
    return (xf * jnp.tanh(jax.nn.softplus(xf))).astype(x.dtype)


if __name__ == "__main__":
    key = jax.random.PRNGKey(0)

    # NCHW activation map, like the conv features in the original network.
    x = jax.random.normal(key, (2, 4, 16, 16), dtype=jnp.float32) * 3.0
    y = mish(x)
    jax.block_until_ready(y)
    assert y.shape == x.shape and y.dtype == x.dtype
    assert jnp.allclose(y, mish_ref(x), atol=1e-5, rtol=1e-5), "f32 mismatch"

    # Tiny ragged shape (< 128 elements): pure XLA tail path.
    xr = jax.random.normal(jax.random.PRNGKey(1), (3, 5, 7), dtype=jnp.float32) * 3.0
    yr = mish(xr)
    jax.block_until_ready(yr)
    assert yr.shape == xr.shape
    assert jnp.allclose(yr, mish_ref(xr), atol=1e-5, rtol=1e-5), "tiny ragged mismatch"

    # Ragged with a %128 body (385 elems): kernel body + XLA tail + concat.
    xb = jax.random.normal(jax.random.PRNGKey(2), (5, 7, 11), dtype=jnp.float32) * 3.0
    yb = mish(xb)
    jax.block_until_ready(yb)
    assert yb.shape == xb.shape
    assert jnp.allclose(yb, mish_ref(xb), atol=1e-5, rtol=1e-5), "ragged body mismatch"

    # bfloat16 input: f32 internal math, approx-reciprocal divide, bf16 store.
    xh = (jax.random.normal(jax.random.PRNGKey(3), (2, 4, 16, 16)) * 3.0).astype(jnp.bfloat16)
    yh = mish(xh)
    jax.block_until_ready(yh)
    assert yh.dtype == jnp.bfloat16
    assert jnp.allclose(yh.astype(jnp.float32), mish_ref(xh).astype(jnp.float32),
                        atol=2e-2, rtol=2e-2), "bf16 mismatch"

    print("KERNEL_OK")
</pallas_src>

<mosaic_0001>
module attributes {stable_mosaic.version = 11 : i64} {
  func.func @_mish_kernel(%arg0: i32, %arg1: memref<16x128xf32, #tpu.memory_space<vmem>>, %arg2: memref<16x128xf32, #tpu.memory_space<vmem>>) attributes {dimension_semantics = [#tpu.dimension_semantics<parallel>], iteration_bounds = array<i64: 1>, scalar_prefetch = 0 : i64, scratch_operands = 0 : i64, tpu.core_type = #tpu.core_type<tc>, window_params = [{transform_indices = @transform_0, window_bounds = array<i64: 16, 128>}, {transform_indices = @transform_1, window_bounds = array<i64: 16, 128>}]} {
    %c0 = arith.constant 0 : index
    %c0_0 = arith.constant 0 : index
    %0 = vector.load %arg1[%c0, %c0_0] : memref<16x128xf32, #tpu.memory_space<vmem>>, vector<16x128xf32>
    %1 = math.absf %0 : vector<16x128xf32>
    %cst = arith.constant 0.000000e+00 : f32
    %2 = vector.broadcast %cst : f32 to vector<16x128xf32>
    %3 = arith.subf %2, %1 : vector<16x128xf32>
    %4 = math.exp %3 : vector<16x128xf32>
    %5 = arith.addf %4, %4 : vector<16x128xf32>
    %6 = arith.mulf %4, %4 : vector<16x128xf32>
    %cst_1 = arith.constant 0.000000e+00 : f32
    %7 = vector.broadcast %cst_1 : f32 to vector<16x128xf32>
    %8 = arith.cmpf oge, %0, %7 : vector<16x128xf32>
    %cst_2 = arith.constant 1.000000e+00 : f32
    %9 = vector.broadcast %cst_2 : f32 to vector<16x128xf32>
    %10 = arith.select %8, %9, %6 : vector<16x128xi1>, vector<16x128xf32>
    %11 = arith.addf %10, %5 : vector<16x128xf32>
    %12 = arith.addf %6, %6 : vector<16x128xf32>
    %cst_3 = arith.constant 2.000000e+00 : f32
    %13 = vector.broadcast %cst_3 : f32 to vector<16x128xf32>
    %14 = arith.select %8, %12, %13 : vector<16x128xi1>, vector<16x128xf32>
    %15 = arith.addf %11, %14 : vector<16x128xf32>
    %16 = arith.divf %11, %15 : vector<16x128xf32>
    %17 = arith.mulf %0, %16 : vector<16x128xf32>
    %c0_4 = arith.constant 0 : index
    %c0_5 = arith.constant 0 : index
    %18 = vector.load %arg2[%c0_4, %c0_5] : memref<16x128xf32, #tpu.memory_space<vmem>>, vector<16x128xf32>
    tpu.vector_store %arg2[%c0_4, %c0_5], %17 {strides = array<i32>} : memref<16x128xf32, #tpu.memory_space<vmem>>, vector<16x128xf32>,
    return
  }
  func.func @transform_0(%arg0: i32) -> (i32, i32) {
    %c0_i32 = arith.constant 0 : i32
    %c0_i32_0 = arith.constant 0 : i32
    return %arg0, %c0_i32 : i32, i32
  }
  func.func @transform_1(%arg0: i32) -> (i32, i32) {
    %c0_i32 = arith.constant 0 : i32
    %c0_i32_0 = arith.constant 0 : i32
    return %arg0, %c0_i32 : i32, i32
  }
}

</mosaic_0001>

<bundles_post_ra>
// kernel: tpu_custom_call.1
= control target key start
LH: loop header
LB: loop body
LE: loop exit
PB: predicated region body
PF: predicated region fallthrough
CT: control target
= control target key end

     0   :  { %6 = vsyncpa [#allocation3], 0  ;;  %s178_s0 = inlined_call_operand.hbm [shape: f32[16,128], index: 0, kind: input, shape index: {}]   ;;  %s179_s1 = inlined_call_operand.hbm [shape: f32[16,128], index: 1, kind: output, shape index: {}]  }
   0x1   :  { %7 = vsyncpa [#allocation4], 0  ;;  %s134_s6 = smov [#allocation2]   ;;  %s86_s10 = scalar_lea.hbm %s178_s0, 256 }
   0x2   :  { %s13_s7 = sshll.u32 %s134_s6, 4  ;;  %p87_p0 = scmp.ne.s32.totalorder %s178_s0, %s86_s10  ;;  %s14_s7 = int_to_ptr.vmem [resolvable:$true] %s13_s7 }
   0x3   :  { %p90_p1 = scmp.lt.u32.totalorder %s86_s10, %s178_s0 }
   0x5   :  { %p92_p2 = pnand %p90_p1, %p87_p0 }
   0x7   :  { %95 = shalt.err (!%p92_p2)
}
   0x8   :  { %s96_s15 = scalar_lea.vmem %s14_s7, 256  ;;  %p101_p4 = scmp.lt.s32.totalorder %s14_s7, %s14_s7 }
   0x9   :  { %p97_p3 = scmp.ne.s32.totalorder %s14_s7, %s96_s15  ;;  %p102_p5 = scmp.lt.s32.totalorder %s96_s15, %s96_s15 }
   0xb   :  { %p103_p6 = por %p102_p5, %p101_p4 }
   0xd   :  { %p104_p7 = pnand %p103_p6, %p97_p3 }
   0xf   :  { %107 = shalt.err (!%p104_p7)
}
  0x10   :  { %s135_s16 = smov 128   ;;  %s136_s17 = smov 8  }
  0x11   :  { %19 = dma.hbm_to_vmem [thread:$0]  %s178_s0, 256, %s14_s7, [#allocation3], %s135_s16, %s135_s16, %s136_s17  }
  0x12   :  { %130 = dma.done.wait [#allocation3], 256  }
  0x13   :  { %131 = vsyncadd [#allocation3], 4294967040  ;;  %v23_v0 = vld [vmem:[#allocation2] sm:$0xff]  ;;  %v24_v1 = vld [vmem:[#allocation2 + $0x8] sm:$0xff]  ;;  %s137_s0 = smov [#allocation5]  }
  0x14   :  { %v25_v2 = vand.u32 2147483647, %v23_v0  ;;  %v26_v3 = vand.u32 2147483647, %v24_v1  ;;  %vm37_vm0 = vcmp.ge.f32.partialorder %v23_v0, 0.0  ;;  %vm38_vm1 = vcmp.ge.f32.partialorder %v24_v1, 0.0 }
  0x15   :  { %s62_s20 = sshll.u32 %s137_s0, 4  ;;  %s63_s20 = int_to_ptr.vmem [resolvable:$true] %s62_s20 }
  0x16   :  { %v27_v4 = vsub.f32 0.0, %v25_v2  ;;  %v28_v5 = vsub.f32 0.0, %v26_v3  ;;  %s108_s21 = scalar_lea.vmem %s63_s20, 256  ;;  %p113_p9 = scmp.lt.s32.totalorder %s63_s20, %s63_s20 }
  0x17   :  { %p109_p8 = scmp.ne.s32.totalorder %s63_s20, %s108_s21  ;;  %p114_p10 = scmp.lt.s32.totalorder %s108_s21, %s108_s21 }
  0x18   :  { %v29_v6 = vmul.f32 1.442695, %v27_v4  ;;  %v31_v7 = vmul.f32 1.442695, %v28_v5 }
  0x19   :  { %p115_p11 = por %p114_p10, %p113_p9 }
  0x1a   :  { %78 = vpow2.f32 %v29_v6 }
  0x1b   :  { %80 = vpow2.f32 %v31_v7  ;;  %p116_p12 = pnand %p115_p11, %p109_p8 }
  0x24   :  { %v79_v8 = vpop.eup %78 }
  0x25   :  { %v81_v9 = vpop.eup %80  ;;  %v33_v10 = vadd.f32 %v79_v8, %v79_v8  ;;  %v35_v11 = vmul.f32 %v79_v8, %v79_v8 }
  0x26   :  { %v34_v12 = vadd.f32 %v81_v9, %v81_v9  ;;  %v36_v13 = vmul.f32 %v81_v9, %v81_v9 }
  0x27   :  { %v39_v14 = vsel %vm37_vm0, 1.0, %v35_v11  ;;  %v43_v15 = vadd.f32 %v35_v11, %v35_v11 }
  0x28   :  { %v41_v16 = vadd.f32 %v39_v14, %v33_v10  ;;  %v40_v17 = vsel %vm38_vm1, 1.0, %v36_v13  ;;  %v44_v18 = vadd.f32 %v36_v13, %v36_v13 }
  0x29   :  { %v45_v19 = vsel %vm37_vm0, %v43_v15, 2.0  ;;  %v42_v20 = vadd.f32 %v40_v17, %v34_v12 }
  0x2a   :  { %v47_v21 = vadd.f32 %v45_v19, %v41_v16  ;;  %v46_v22 = vsel %vm38_vm1, %v44_v18, 2.0 }
  0x2b   :  { %v48_v23 = vadd.f32 %v46_v22, %v42_v20 }
  0x2c   :  { %82 = vrcp.f32 %v47_v21 }
  0x2d   :  { %84 = vrcp.f32 %v48_v23 }
  0x36   :  { %v83_v24 = vpop.eup %82 }
  0x37   :  { %v85_v25 = vpop.eup %84  ;;  %v50_v26 = vmul.f32 %v83_v24, %v41_v16 }
  0x38   :  { %v52_v27 = vmul.f32 %v85_v25, %v42_v20 }
  0x39   :  { %v53_v28 = vmul.f32 %v50_v26, %v23_v0 }
  0x3a   :  { %v54_v29 = vmul.f32 %v52_v27, %v24_v1 }
  0x3b   :  { %55 = vst [vmem:[#allocation5] sm:$0xff] %v53_v28 }
  0x3c   :  { %56 = vst [vmem:[#allocation5 + $0x8] sm:$0xff] %v54_v29 }
  0x3d   :  { %119 = shalt.err (!%p116_p12)
}
  0x3e   :  { %s120_s24 = scalar_lea.hbm %s179_s1, 256 }
  0x3f   :  { %p121_p13 = scmp.ne.s32.totalorder %s179_s1, %s120_s24  ;;  %p124_p0 = scmp.lt.u32.totalorder %s120_s24, %s179_s1 }
  0x41   :  { %p126_p1 = pnand %p124_p0, %p121_p13 }
  0x43   :  { %129 = shalt.err (!%p126_p1)
}
  0x44   :  { %68 = dma.vmem_to_hbm [thread:$0]  %s63_s20, 256, %s179_s1, [#allocation4], %s135_s16, %s135_s16, %s136_s17  }
  0x45   :  { %132 = dma.done.wait [#allocation4], 256  }
  0x46   :  { %133 = vsyncadd [#allocation4], 4294967040 }
  0x47   :  { %72 = vsyncpa [#allocation3], 1 }
  0x48   :  { %73 = vsyncpa [#allocation4], 1 }

</bundles_post_ra>
